<compile_context>
chip_gen: v5e
topology: v5e:2x2
jax: 0.10.0
libtpu: 0.0.40
codegen_flags: <defaults>
</compile_context>

<pallas_src>
import functools

import jax
import jax.numpy as jnp
from jax.experimental import pallas as pl
from jax.experimental.pallas import tpu as pltpu


def _round_up(n, m):
    return (n + m - 1) // m * m


def _pick_tile_h(h):
    for t in (8, 4, 2, 1):
        if h % t == 0:
            return t
    return 1


def _residual_kernel(xpad_ref, w3_ref, w1_ref, o_ref, *, W, C, TH):
    """One (batch, row-tile) grid step.

    xpad_ref: [1, H+2, W+2, C] f32  spatially zero-padded input (pre-ReLU).
                                    Constant block index along the row-tile
                                    axis -> resident in VMEM, no re-DMA.
    w3_ref:   [3, 3*C, Rp]     bf16 3x3 conv; the 3 taps of each kernel row
                                    packed along K (dj-major, cin-minor).
    w1_ref:   [Rp, C]          bf16 1x1 conv (R zero-padded to Rp).
    o_ref:    [1, TH*W, C]     f32  output rows of this tile.
    """
    rp = w1_ref.shape[0]
    row0 = pl.program_id(1) * TH

    # Load the (TH+2)-row halo window once.  It provides both the bf16 conv
    # operand (after a single, hoisted ReLU) and the exact f32 residual.
    xw = xpad_ref[0, pl.ds(row0, TH + 2), :, :]            # [TH+2, W+2, C] f32
    xr = jnp.maximum(xw, 0.0).astype(jnp.bfloat16)         # ReLU(x), once

    # 3x3 conv as 3 accumulating MXU dots (one per kernel row), K = 3*C.
    acc = jnp.zeros((TH * W, rp), jnp.float32)
    for di in range(3):
        rows = xr[di:di + TH]                              # [TH, W+2, C]
        patch = jnp.concatenate(
            [rows[:, dj:dj + W, :] for dj in range(3)], axis=-1)  # [TH, W, 3C]
        acc += jnp.dot(patch.reshape(TH * W, 3 * C), w3_ref[di],
                       preferred_element_type=jnp.float32)

    hid = jnp.maximum(acc, 0.0).astype(jnp.bfloat16)       # ReLU -> bf16 (MXU)
    y = jnp.dot(hid, w1_ref[...], preferred_element_type=jnp.float32)  # [TM, C]

    res = xw[1:TH + 1, 1:W + 1, :].reshape(TH * W, C)      # exact f32 residual
    o_ref[0] = res + y


def residual_forward(x_nchw, w3_hwio, w1_hwio):
    """x_nchw: [N, C, H, W] f32;  w3_hwio: [3, 3, C, R];  w1_hwio: [1, 1, R, C]."""
    N, C, H, W = x_nchw.shape
    R = w3_hwio.shape[-1]
    Rp = _round_up(R, 128)        # MXU-friendly width for the hidden activation
    TH = _pick_tile_h(H)          # row tile: bounds vreg pressure + 2nd grid axis
    assert H % TH == 0

    # NHWC, spatial zero-pad of 1.  Kept at true C and in f32: one HBM stream
    # serves both the bf16 conv operand and the exact f32 residual.
    x = jnp.transpose(x_nchw, (0, 2, 3, 1)).astype(jnp.float32)
    xpad = jnp.pad(x, ((0, 0), (1, 1), (1, 1), (0, 0)))    # [N, H+2, W+2, C]

    # 3x3 weights: taps of each kernel row packed along K (dj-major, c-minor)
    # -> [3, 3C, Rp].  Only the small R dim is zero-padded (MXU N dim / the
    # following 1x1 matmul's K dim).
    w3 = jnp.pad(w3_hwio.reshape(3, 3 * C, R),
                 ((0, 0), (0, 0), (0, Rp - R))).astype(jnp.bfloat16)
    w1 = jnp.pad(w1_hwio.reshape(R, C),
                 ((0, Rp - R), (0, 0))).astype(jnp.bfloat16)

    out = pl.pallas_call(
        functools.partial(_residual_kernel, W=W, C=C, TH=TH),
        out_shape=jax.ShapeDtypeStruct((N, H * W, C), jnp.float32),
        grid=(N, H // TH),
        in_specs=[
            # Full padded image per batch element; constant along the h axis.
            pl.BlockSpec((1, H + 2, W + 2, C), lambda b, h: (b, 0, 0, 0)),
            pl.BlockSpec((3, 3 * C, Rp), lambda b, h: (0, 0, 0)),
            pl.BlockSpec((Rp, C), lambda b, h: (0, 0)),
        ],
        out_specs=pl.BlockSpec((1, TH * W, C), lambda b, h: (b, h, 0)),
        compiler_params=pltpu.CompilerParams(
            dimension_semantics=("parallel", "parallel"),
            vmem_limit_bytes=32 * 1024 * 1024),
    )(xpad, w3, w1)

    out = out.reshape(N, H, W, C)
    return jnp.transpose(out, (0, 3, 1, 2))                # NCHW


# ----------------------------------------------------------------------------
# Pure-JAX f32 reference of the PyTorch forward (for a correctness check)
# ----------------------------------------------------------------------------
def residual_reference(x_nchw, w3_hwio, w1_hwio):
    x = jnp.transpose(x_nchw, (0, 2, 3, 1))
    dn = ("NHWC", "HWIO", "NHWC")
    h = jax.lax.conv_general_dilated(jnp.maximum(x, 0.0), w3_hwio,
                                     window_strides=(1, 1), padding="SAME",
                                     dimension_numbers=dn)
    y = jax.lax.conv_general_dilated(jnp.maximum(h, 0.0), w1_hwio,
                                     window_strides=(1, 1), padding="SAME",
                                     dimension_numbers=dn)
    return jnp.transpose(x + y, (0, 3, 1, 2))


if __name__ == "__main__":
    key = jax.random.PRNGKey(0)
    kx, k3, k1 = jax.random.split(key, 3)

    batch = 2
    num_hiddens = 32            # in_channels == num_hiddens (required by x + block(x))
    num_residual_hiddens = 16
    spatial = 16

    x = jax.random.normal(kx, (batch, num_hiddens, spatial, spatial), jnp.float32)
    w3 = jax.random.normal(k3, (3, 3, num_hiddens, num_residual_hiddens),
                           jnp.float32) * 0.05    # conv3x3, bias=False
    w1 = jax.random.normal(k1, (1, 1, num_residual_hiddens, num_hiddens),
                           jnp.float32) * 0.05    # conv1x1, bias=False

    fwd = jax.jit(residual_forward)
    out = jax.block_until_ready(fwd(x, w3, w1))

    assert out.shape == x.shape, out.shape
    assert bool(jnp.all(jnp.isfinite(out)))

    ref = residual_reference(x, w3, w1)
    err = float(jnp.max(jnp.abs(out - ref)))
    assert err < 3e-2, f"max abs err vs f32 reference: {err}"

    print("KERNEL_OK")
</pallas_src>

<mosaic_0001>
module attributes {stable_mosaic.version = 11 : i64} {
  func.func @_residual_kernel(%arg0: i32, %arg1: i32, %arg2: memref<1x18x18x32xf32, #tpu.memory_space<vmem>>, %arg3: memref<3x96x128xbf16, #tpu.memory_space<vmem>>, %arg4: memref<128x32xbf16, #tpu.memory_space<vmem>>, %arg5: memref<1x128x32xf32, #tpu.memory_space<vmem>>) attributes {dimension_semantics = [#tpu.dimension_semantics<parallel>, #tpu.dimension_semantics<parallel>], iteration_bounds = array<i64: 2, 2>, scalar_prefetch = 0 : i64, scratch_operands = 0 : i64, tpu.core_type = #tpu.core_type<tc>, window_params = [{transform_indices = @transform_0, window_bounds = array<i64: 1, 18, 18, 32>}, {pipeline_mode = #tpu.pipeline_mode<synchronous>, transform_indices = @transform_1, window_bounds = array<i64: 3, 96, 128>}, {pipeline_mode = #tpu.pipeline_mode<synchronous>, transform_indices = @transform_2, window_bounds = array<i64: 128, 32>}, {transform_indices = @transform_3, window_bounds = array<i64: 1, 128, 32>}]} {
    %c8_i32 = arith.constant 8 : i32
    %0 = arith.muli %arg1, %c8_i32 : i32
    %c0 = arith.constant 0 : index
    %1 = arith.index_cast %0 : i32 to index
    %c0_0 = arith.constant 0 : index
    %c0_1 = arith.constant 0 : index
    %2 = vector.load %arg2[%c0, %1, %c0_0, %c0_1] : memref<1x18x18x32xf32, #tpu.memory_space<vmem>>, vector<1x10x18x32xf32>
    %3 = vector.shape_cast %2 : vector<1x10x18x32xf32> to vector<10x18x32xf32>
    %cst = arith.constant 0.000000e+00 : f32
    %4 = vector.broadcast %cst : f32 to vector<10x18x32xf32>
    %5 = arith.maximumf %3, %4 : vector<10x18x32xf32>
    %6 = arith.truncf %5 : vector<10x18x32xf32> to vector<10x18x32xbf16>
    %cst_2 = arith.constant 0.000000e+00 : f32
    %7 = vector.broadcast %cst_2 : f32 to vector<128x128xf32>
    %8 = vector.extract_strided_slice %6 {offsets = [0, 0, 0], sizes = [8, 18, 32], strides = [1, 1, 1]} : vector<10x18x32xbf16> to vector<8x18x32xbf16>
    %9 = vector.extract_strided_slice %8 {offsets = [0, 0, 0], sizes = [8, 16, 32], strides = [1, 1, 1]} : vector<8x18x32xbf16> to vector<8x16x32xbf16>
    %10 = vector.extract_strided_slice %8 {offsets = [0, 1, 0], sizes = [8, 16, 32], strides = [1, 1, 1]} : vector<8x18x32xbf16> to vector<8x16x32xbf16>
    %11 = vector.extract_strided_slice %8 {offsets = [0, 2, 0], sizes = [8, 16, 32], strides = [1, 1, 1]} : vector<8x18x32xbf16> to vector<8x16x32xbf16>
    %12 = tpu.concatenate %9, %10, %11 in 2 : vector<8x16x32xbf16>, vector<8x16x32xbf16>, vector<8x16x32xbf16> -> vector<8x16x96xbf16>
    %13 = vector.shape_cast %12 : vector<8x16x96xbf16> to vector<128x96xbf16>
    %c0_3 = arith.constant 0 : index
    %c0_4 = arith.constant 0 : index
    %c0_5 = arith.constant 0 : index
    %14 = vector.load %arg3[%c0_3, %c0_4, %c0_5] : memref<3x96x128xbf16, #tpu.memory_space<vmem>>, vector<1x96x128xbf16>
    %15 = vector.shape_cast %14 : vector<1x96x128xbf16> to vector<96x128xbf16>
    %cst_6 = arith.constant dense<0.000000e+00> : vector<128x128xf32>
    %16 = tpu.matmul %13, %15, %cst_6 {dimension_numbers = #tpu.dot_dimension_numbers<[1], [0], [0], [1], [0, 0, 1, 1], [], []>} : vector<128x96xbf16>, vector<96x128xbf16>, vector<128x128xf32> -> vector<128x128xf32>
    %17 = arith.addf %7, %16 : vector<128x128xf32>
    %18 = vector.extract_strided_slice %6 {offsets = [1, 0, 0], sizes = [8, 18, 32], strides = [1, 1, 1]} : vector<10x18x32xbf16> to vector<8x18x32xbf16>
    %19 = vector.extract_strided_slice %18 {offsets = [0, 0, 0], sizes = [8, 16, 32], strides = [1, 1, 1]} : vector<8x18x32xbf16> to vector<8x16x32xbf16>
    %20 = vector.extract_strided_slice %18 {offsets = [0, 1, 0], sizes = [8, 16, 32], strides = [1, 1, 1]} : vector<8x18x32xbf16> to vector<8x16x32xbf16>
    %21 = vector.extract_strided_slice %18 {offsets = [0, 2, 0], sizes = [8, 16, 32], strides = [1, 1, 1]} : vector<8x18x32xbf16> to vector<8x16x32xbf16>
    %22 = tpu.concatenate %19, %20, %21 in 2 : vector<8x16x32xbf16>, vector<8x16x32xbf16>, vector<8x16x32xbf16> -> vector<8x16x96xbf16>
    %23 = vector.shape_cast %22 : vector<8x16x96xbf16> to vector<128x96xbf16>
    %c1 = arith.constant 1 : index
    %c0_7 = arith.constant 0 : index
    %c0_8 = arith.constant 0 : index
    %24 = vector.load %arg3[%c1, %c0_7, %c0_8] : memref<3x96x128xbf16, #tpu.memory_space<vmem>>, vector<1x96x128xbf16>
    %25 = vector.shape_cast %24 : vector<1x96x128xbf16> to vector<96x128xbf16>
    %cst_9 = arith.constant dense<0.000000e+00> : vector<128x128xf32>
    %26 = tpu.matmul %23, %25, %cst_9 {dimension_numbers = #tpu.dot_dimension_numbers<[1], [0], [0], [1], [0, 0, 1, 1], [], []>} : vector<128x96xbf16>, vector<96x128xbf16>, vector<128x128xf32> -> vector<128x128xf32>
    %27 = arith.addf %17, %26 : vector<128x128xf32>
    %28 = vector.extract_strided_slice %6 {offsets = [2, 0, 0], sizes = [8, 18, 32], strides = [1, 1, 1]} : vector<10x18x32xbf16> to vector<8x18x32xbf16>
    %29 = vector.extract_strided_slice %28 {offsets = [0, 0, 0], sizes = [8, 16, 32], strides = [1, 1, 1]} : vector<8x18x32xbf16> to vector<8x16x32xbf16>
    %30 = vector.extract_strided_slice %28 {offsets = [0, 1, 0], sizes = [8, 16, 32], strides = [1, 1, 1]} : vector<8x18x32xbf16> to vector<8x16x32xbf16>
    %31 = vector.extract_strided_slice %28 {offsets = [0, 2, 0], sizes = [8, 16, 32], strides = [1, 1, 1]} : vector<8x18x32xbf16> to vector<8x16x32xbf16>
    %32 = tpu.concatenate %29, %30, %31 in 2 : vector<8x16x32xbf16>, vector<8x16x32xbf16>, vector<8x16x32xbf16> -> vector<8x16x96xbf16>
    %33 = vector.shape_cast %32 : vector<8x16x96xbf16> to vector<128x96xbf16>
    %c2 = arith.constant 2 : index
    %c0_10 = arith.constant 0 : index
    %c0_11 = arith.constant 0 : index
    %34 = vector.load %arg3[%c2, %c0_10, %c0_11] : memref<3x96x128xbf16, #tpu.memory_space<vmem>>, vector<1x96x128xbf16>
    %35 = vector.shape_cast %34 : vector<1x96x128xbf16> to vector<96x128xbf16>
    %cst_12 = arith.constant dense<0.000000e+00> : vector<128x128xf32>
    %36 = tpu.matmul %33, %35, %cst_12 {dimension_numbers = #tpu.dot_dimension_numbers<[1], [0], [0], [1], [0, 0, 1, 1], [], []>} : vector<128x96xbf16>, vector<96x128xbf16>, vector<128x128xf32> -> vector<128x128xf32>
    %37 = arith.addf %27, %36 : vector<128x128xf32>
    %cst_13 = arith.constant 0.000000e+00 : f32
    %38 = vector.broadcast %cst_13 : f32 to vector<128x128xf32>
    %39 = arith.maximumf %37, %38 : vector<128x128xf32>
    %40 = arith.truncf %39 : vector<128x128xf32> to vector<128x128xbf16>
    %c0_14 = arith.constant 0 : index
    %c0_15 = arith.constant 0 : index
    %41 = vector.load %arg4[%c0_14, %c0_15] : memref<128x32xbf16, #tpu.memory_space<vmem>>, vector<128x32xbf16>
    %cst_16 = arith.constant dense<0.000000e+00> : vector<128x32xf32>
    %42 = tpu.matmul %40, %41, %cst_16 {dimension_numbers = #tpu.dot_dimension_numbers<[1], [0], [0], [1], [0, 0, 1, 1], [], []>} : vector<128x128xbf16>, vector<128x32xbf16>, vector<128x32xf32> -> vector<128x32xf32>
    %43 = vector.extract_strided_slice %3 {offsets = [1, 1, 0], sizes = [8, 16, 32], strides = [1, 1, 1]} : vector<10x18x32xf32> to vector<8x16x32xf32>
    %44 = vector.shape_cast %43 : vector<8x16x32xf32> to vector<128x32xf32>
    %45 = arith.addf %44, %42 : vector<128x32xf32>
    %c0_17 = arith.constant 0 : index
    %c0_18 = arith.constant 0 : index
    %c0_19 = arith.constant 0 : index
    %46 = vector.load %arg5[%c0_17, %c0_18, %c0_19] : memref<1x128x32xf32, #tpu.memory_space<vmem>>, vector<1x128x32xf32>
    %47 = vector.shape_cast %46 : vector<1x128x32xf32> to vector<128x32xf32>
    %48 = vector.shape_cast %45 : vector<128x32xf32> to vector<1x128x32xf32>
    tpu.vector_store %arg5[%c0_17, %c0_18, %c0_19], %48 {strides = array<i32>} : memref<1x128x32xf32, #tpu.memory_space<vmem>>, vector<1x128x32xf32>,
    return
  }
  func.func @transform_0(%arg0: i32, %arg1: i32) -> (i32, i32, i32, i32) {
    %c0_i32 = arith.constant 0 : i32
    %c0_i32_0 = arith.constant 0 : i32
    %c0_i32_1 = arith.constant 0 : i32
    %c0_i32_2 = arith.constant 0 : i32
    return %arg0, %c0_i32, %c0_i32_0, %c0_i32_1 : i32, i32, i32, i32
  }
  func.func @transform_1(%arg0: i32, %arg1: i32) -> (i32, i32, i32) {
    %c0_i32 = arith.constant 0 : i32
    %c0_i32_0 = arith.constant 0 : i32
    %c0_i32_1 = arith.constant 0 : i32
    %c0_i32_2 = arith.constant 0 : i32
    return %c0_i32, %c0_i32_0, %c0_i32_1 : i32, i32, i32
  }
  func.func @transform_2(%arg0: i32, %arg1: i32) -> (i32, i32) {
    %c0_i32 = arith.constant 0 : i32
    %c0_i32_0 = arith.constant 0 : i32
    %c0_i32_1 = arith.constant 0 : i32
    return %c0_i32, %c0_i32_0 : i32, i32
  }
  func.func @transform_3(%arg0: i32, %arg1: i32) -> (i32, i32, i32) {
    %c0_i32 = arith.constant 0 : i32
    %c0_i32_0 = arith.constant 0 : i32
    return %arg0, %arg1, %c0_i32 : i32, i32, i32
  }
}

</mosaic_0001>

<bundles_post_ra>
// kernel: residual_forward.1
= control target key start
LH: loop header
LB: loop body
LE: loop exit
PB: predicated region body
PF: predicated region fallthrough
CT: control target
= control target key end

     0   :  { %8 = vsyncpa [#allocation3], 0  ;;  %s2185_s0 = inlined_call_operand.vmem [shape: f32[2,18,18,32], index: 0, kind: input, shape index: {}]   ;;  %s2186_s1 = inlined_call_operand.vmem [shape: bf16[3,96,128], index: 1, kind: input, shape index: {}]   ;;  %s2187_s2 = inlined_call_operand.vmem [shape: bf16[128,32], index: 2, kind: input, shape index: {}]   ;;  %s2188_s3 = inlined_call_operand.hbm [shape: f32[2,256,32], index: 3, kind: output, shape index: {}]  }
   0x1   :  { %10 = vsyncpa [#allocation3 + $0x1], 0  ;;  %s1658_s12 = smov 0   ;;  %s1660_s13 = smov 0  }
   0x2   :  { %s1662_s14 = smov 0   ;;  %s1664_s15 = smov 0  }
   0x3   :  { %s1666_s16 = smov 0   ;;  %s1668_s17 = smov 0  }
   0x4   :  { %s1670_s18 = smov 0   ;;  %s1672_s19 = smov 0  }
   0x5 LB: > { %s1268_s20 = sadd.s32 4294967295, %s1632_s19   ;;  %s1269_s21 = sadd.s32 4294967294, %s1632_s19   ;;  %s1632_s19 = sphi %s1672_s19, %s16_s19   ;;  %s1628_s18 = sphi %s1670_s18, %s2197_s18   ;;  %s1624_s17 = sphi %s1668_s17, %s2196_s17   ;;  %s1620_s16 = sphi %s1666_s16, %s2195_s16   ;;  %s1616_s15 = sphi %s1664_s15, %s2194_s15   ;;  %s1612_s14 = sphi %s1662_s14, %s2193_s14   ;;  %s1608_s13 = sphi %s1660_s13, %s2192_s13   ;;  %s1604_s12 = sphi %s1658_s12, %s2191_s12  }
   0x6   : > { %s25_s22 = sadd.s32 1, %s1624_s17  ;;  %s28_s23 = sadd.s32 1, %s1628_s18 }
   0x7   : > { %p26_p0 = scmp.ge.s32.totalorder %s25_s22, 2  ;;  %p115_p1 = scmp.ne.s32.totalorder %s1612_s14, %s1608_s13 }
   0x8   : > { %p116_p2 = scmp.eq.s32.totalorder %s1268_s20, 3  ;;  %p121_p5 = scmp.ne.s32.totalorder %s1608_s13, %s1604_s12 }
   0x9   : > { %s2199_s22 = smov (%p26_p0, %s25_s22), 0  ;;  %s2201_s23 = smov (!%p26_p0, %s28_s23), %s1628_s18 }
   0xa   : > { %s101_s24 = ssub.s32 %s1624_s17, %s2199_s22  ;;  %p1709_p3 = por %p116_p2, %p115_p1 }
   0xb   : > { %p30_p4 = scmp.ge.s32.totalorder %s2201_s23, 2  ;;  %p122_p6 = scmp.eq.s32.totalorder %s1269_s21, 3 }
   0xc   : > { %p1272_p7 = scmp.ge.s32.totalorder %s1632_s19, 1  ;;  %p154_p9 = scmp.lt.s32.totalorder %s1632_s19, 5 }
   0xd   : > { %s2203_s23 = smov (%p30_p4, %s2201_s23), 0  ;;  %p1718_p8 = por %p122_p6, %p121_p5 }
   0xe   : > { %s100_s27 = ssub.s32 %s1628_s18, %s2203_s23  ;;  %s105_s28 = sadd.s32 1, %s1612_s14 }
   0xf   : > { %s102_s29 = sor.u32 %s101_s24, %s100_s27  ;;  %p155_p10 = pnand %p1272_p7, %p154_p9 }
  0x10   : > { %p103_p11 = scmp.eq.s32.totalorder %s102_s29, 0  ;;  %p178_p12 = scmp.lt.s32.totalorder (!%p155_p10), %s1620_s16, 1 }
  0x11   : > { %158 = sbr.rel (%p155_p10) target bundleno = 572 (0x23c), region = 32  ;;  %s1634_s11 = smov (!%p155_p10), 32  }
  0x12   : > { %s1727_s30 = scalar_select %p103_p11, %s1612_s14, %s105_s28  }
  0x13   : > { %s1276_s5 = smul.u32 (!%p155_p10), 192, %s1616_s15  ;;  %s1635_s20 = smov (!%p155_p10), 64  }
  0x14   : > { %s175_s29 = sand.u32 (!%p155_p10), 1, %s1608_s13  }
  0x15   : > { %s1173_s27 = scalar_lea.sflag (!%p155_p10), [#allocation3], %s175_s29 }
  0x16   : > { %s179_s4 = scalar_select %p178_p12, %s1620_s16, 1  ;;  %vm342_vm0 = vsmask.f32 7424  ;;  %vm455_vm1 = vcmask 1046528   ;;  %vm496_vm2 = vcmask 261120   ;;  %vm513_vm3 = vcmask 523264  }
  0x17   : > { %vm622_vm4 = vcmask 785408  }
  0x18   : > { %s1461_s6 = smul.u32 432, %s179_s4  ;;  %s1273_s4 = sshll.u32 %s175_s29, 7 }
  0x1a   : > { %s182_s9 = scalar_lea.vmem %s2185_s0, %s1461_s6  ;;  %s1431_s6 = sshll.u32 %s1620_s16, 5 }
  0x1b   : > { %s1735_s10 = scalar_lea.vmem %s182_s9, %s1276_s5  ;;  %s2069_s5 = scalar_lea.vmem [#allocation2], %s1273_s4 }
  0x1c   : > { %v1738_v0 = vld [vmem:[%s1735_s10 + $0x30] sm:$0xff]  ;;  %v1741_v1 = vld [vmem:[%s1735_s10 + $0x38] sm:$0xff]  ;;  %v196_v2 = vld [vmem:[%s1735_s10 + $0x40] sm:$0x3]  ;;  %s1187_s16 = sshll.u32 %s2069_s5, 4  ;;  %s1188_s16 = int_to_ptr.vmem [resolvable:$true] %s1187_s16 }
  0x1d   : > { %v224_v3 = vmax.f32 %v1738_v0, 0.0  ;;  %v225_v4 = vmax.f32 %v1741_v1, 0.0  ;;  %v226_v5 = vmax.f32 %v196_v2, 0.0  ;;  %v188_v6 = vld [vmem:[%s1735_s10] sm:$0xff]  ;;  %v189_v7 = vld [vmem:[%s1735_s10 + $0x8] sm:$0xff]  ;;  %v1749_v8 = vld [vmem:[%s1735_s10 + $0x18] sm:$0xff] }
  0x1e   : > { %v190_v9 = vld [vmem:[%s1735_s10 + $0x10] sm:$0x3]  ;;  %v218_v10 = vmax.f32 %v188_v6, 0.0  ;;  %v219_v11 = vmax.f32 %v189_v7, 0.0  ;;  %v1753_v12 = vld [vmem:[%s1735_s10 + $0x20] sm:$0xff]  ;;  %v221_v13 = vmax.f32 %v1749_v8, 0.0 }
  0x1f   : > { %v254_v14 = vpack.c.bf16 %v224_v3, %v224_v3  ;;  %v255_v15 = vpack.c.bf16 %v225_v4, %v225_v4  ;;  %v256_v16 = vpack.c.bf16 %v226_v5, %v226_v5  ;;  %v220_v17 = vmax.f32 %v190_v9, 0.0  ;;  %v1757_v18 = vld [vmem:[%s1735_s10 + $0x28] sm:$0x3]  ;;  %v1771_v43 = vld [vmem:[%s1735_s10 + $0x50] sm:$0xff]  ;;  %v1780_v52 = vld [vmem:[%s1735_s10 + $0x58] sm:$0x3] }
  0x20   : > { %v248_v19 = vpack.c.bf16 %v218_v10, %v218_v10  ;;  %v249_v20 = vpack.c.bf16 %v219_v11, %v219_v11  ;;  %v222_v21 = vmax.f32 %v1753_v12, 0.0  ;;  %v223_v22 = vmax.f32 %v1757_v18, 0.0  ;;  %v1764_v34 = vld [vmem:[%s1735_s10 + $0x48] sm:$0xff]  ;;  %v1789_v7 = vld [vmem:[%s1735_s10 + $0x60] sm:$0xff] }
  0x21   : > { %v298_v23 = vunpack.c.l.b16 %v254_v14  ;;  %v299_v24 = vunpack.c.l.b16 %v255_v15  ;;  %v328_v25 = vunpack.c.l.b16 %v256_v16  ;;  %v250_v26 = vpack.c.bf16 %v220_v17, %v220_v17  ;;  %v1794_v14 = vld [vmem:[%s1735_s10 + $0x68] sm:$0xff]  ;;  %v1797_v15 = vld [vmem:[%s1735_s10 + $0x70] sm:$0x3] }
  0x22   : > { %v294_v27 = vunpack.c.l.b16 %v248_v19  ;;  %v295_v28 = vunpack.c.l.b16 %v249_v20  ;;  %v251_v29 = vpack.c.bf16 %v221_v13, %v221_v13  ;;  %v252_v30 = vpack.c.bf16 %v222_v21, %v222_v21 }
  0x23   : > { %v1761_v31 = vpack.c.b16 %v299_v24, %v298_v23  ;;  %v336_v32 = vpack.c.b16 %v328_v25, %v328_v25  ;;  %v326_v33 = vunpack.c.l.b16 %v250_v26  ;;  %v253_v36 = vpack.c.bf16 %v223_v22, %v223_v22 }
  0x24   : > { %v1766_v35 = vpack.c.b16 %v295_v28, %v294_v27  ;;  %v296_v37 = vunpack.c.l.b16 %v251_v29  ;;  %v297_v38 = vunpack.c.l.b16 %v252_v30  ;;  %v227_v47 = vmax.f32 %v1764_v34, 0.0 }
  0x25   : > { %v368_v39 = vshrl.u32 %v1761_v31, 16  ;;  %v370_v40 = vshll.u32 %v1761_v31, 16  ;;  %v375_v41 = vshll.u32 %v336_v32, 16  ;;  %v334_v42 = vpack.c.b16 %v326_v33, %v326_v33 }
  0x26   : > { %v344_v44 = vshrl.u32 %v1766_v35, 16  ;;  %v346_v45 = vshll.u32 %v1766_v35, 16  ;;  %v462_v46 = vrot.slane %v1761_v31, 1  ;;  %v1777_v51 = vpack.c.b16 %v297_v38, %v296_v37  ;;  %v1814_v37 = vld [vmem:[%s1735_s10 + $0x80] sm:$0xff] }
  0x27   : > { %v372_v48 = vrot.slane %v370_v40, 1  ;;  %v377_v49 = vrot.slane %v375_v41, 1  ;;  %v351_v50 = vshll.u32 %v334_v42, 16  ;;  %v463_v54 = vrot.slane %v336_v32, 1 }
  0x28   : > { %v348_v53 = vrot.slane %v346_v45, 1  ;;  %v327_v55 = vunpack.c.l.b16 %v253_v36  ;;  %v228_v56 = vmax.f32 %v1771_v43, 0.0  ;;  %v356_v59 = vshrl.u32 %v1777_v51, 16  ;;  %v1811_v36 = vld [vmem:[%s1735_s10 + $0x78] sm:$0xff] }
  0x29   : > { %v373_v57 = vor.u32 %v372_v48, %v368_v39  ;;  %v353_v58 = vrot.slane %v351_v50, 1  ;;  %v358_v60 = vshll.u32 %v1777_v51, 16  ;;  %v229_v63 = vmax.f32 %v1780_v52, 0.0 }
  0x2a   : > { %v349_v61 = vor.u32 %v348_v53, %v344_v44  ;;  %v335_v62 = vpack.c.b16 %v327_v55, %v327_v55  ;;  %v257_v2 = vpack.c.bf16 %v227_v47, %v227_v47  ;;  %v258_v5 = vpack.c.bf16 %v228_v56, %v228_v56  ;;  %v1828_v55 = vld [vmem:[%s1735_s10 + $0x98] sm:$0xff] }
  0x2b   : > { %v378_v3 = vsel %vm342_vm0, %v373_v57, %v377_v49  ;;  %v360_v4 = vrot.slane %v358_v60, 1  ;;  %v456_v6 = vrot.slane %v1766_v35, 1  ;;  %v259_v11 = vpack.c.bf16 %v229_v63, %v229_v63  ;;  %v1440_v60 = vld [vmem:[%s2186_s1 + $0x28] sm:$0xff] }
  0x2c   : > { %443 = vrot.lane.b32.xlu0 %v378_v3, %s1634_s11  ;;  %v354_v9 = vsel %vm342_vm0, %v349_v61, %v353_v58  ;;  %v363_v10 = vshll.u32 %v335_v62, 16  ;;  %v300_v13 = vunpack.c.l.b16 %v257_v2  ;;  %v464_v16 = vsel %vm455_vm1, %v462_v46, %v463_v54  ;;  %v1825_v54 = vld [vmem:[%s1735_s10 + $0x90] sm:$0xff]  ;;  %v1452_v61 = vld [vmem:[%s2186_s1 + $0x88] sm:$0xff]  ;;  %728 = vmatpush.bf16.msra.mxu1 %v1440_v60 }
  0x2d   : > { %439 = vrot.lane.b32.xlu1 %v354_v9, %s1634_s11  ;;  %v361_v17 = vor.u32 %v360_v4, %v356_v59  ;;  %v301_v19 = vunpack.c.l.b16 %v258_v5  ;;  %v457_v20 = vrot.slane %v334_v42, 1  ;;  %v329_v22 = vunpack.c.l.b16 %v259_v11  ;;  %v1820_v42 = vld [vmem:[%s1735_s10 + $0x88] sm:$0x3]  ;;  %v1446_v4 = vld [vmem:[%s2186_s1 + $0x58] sm:$0xff]  ;;  %v1846_v9 = vld [vmem:[%s1735_s10 + $0xa0] sm:$0x3]  ;;  %859 = vmatpush.bf16.msra.mxu2 %v1452_v61 }
  0x2e   : > { %v365_v21 = vrot.slane %v363_v10, 1  ;;  %v459_v23 = vrot.slane %v1777_v51, 1  ;;  %v230_v24 = vmax.f32 %v1789_v7, 0.0  ;;  %v231_v27 = vmax.f32 %v1794_v14, 0.0  ;;  %641 = vmatpush.bf16.msra.mxu0 %v1446_v4 }
  0x2f   : > { %v1803_v25 = vpack.c.b16 %v301_v19, %v300_v13  ;;  %v458_v26 = vsel %vm455_vm1, %v456_v6, %v457_v20  ;;  %v232_v28 = vmax.f32 %v1797_v15, 0.0  ;;  %v337_v30 = vpack.c.b16 %v329_v22, %v329_v22  ;;  %v1439_v13 = vld [vmem:[%s2186_s1 + $0x20] sm:$0xff]  ;;  %v1445_v22 = vld [vmem:[%s2186_s1 + $0x50] sm:$0xff] }
  0x30   : > { %v366_v29 = vsel %vm342_vm0, %v361_v17, %v365_v21  ;;  %480 = vrot.lane.b32.xlu2 %v458_v26, %s1635_s20  ;;  %v460_v32 = vrot.slane %v335_v62, 1  ;;  %v260_v33 = vpack.c.bf16 %v230_v24, %v230_v24  ;;  %v261_v41 = vpack.c.bf16 %v231_v27, %v231_v27  ;;  %729 = vmatpush.bf16.msra.mxu1 %v1439_v13 }
  0x31   : > { %v380_v38 = vshrl.u32 %v1803_v25, 16  ;;  %v382_v39 = vshll.u32 %v1803_v25, 16  ;;  %v465_v40 = vrot.slane %v1803_v25, 1  ;;  %v387_v44 = vshll.u32 %v337_v30, 16 }
  0x32   : > { %v466_v45 = vrot.slane %v337_v30, 1  ;;  %v262_v46 = vpack.c.bf16 %v232_v28, %v232_v28  ;;  %v302_v47 = vunpack.c.l.b16 %v260_v33  ;;  %v303_v49 = vunpack.c.l.b16 %v261_v41  ;;  %v1438_v41 = vld [vmem:[%s2186_s1 + $0x18] sm:$0xff]  ;;  %642 = vmatpush.bf16.msra.mxu0 %v1445_v22 }
  0x33   : > { %v384_v48 = vrot.slane %v382_v39, 1  ;;  %v233_v50 = vmax.f32 %v1811_v36, 0.0  ;;  %v234_v53 = vmax.f32 %v1814_v37, 0.0  ;;  %v389_v56 = vrot.slane %v387_v44, 1  ;;  %v1450_v44 = vld [vmem:[%s2186_s1 + $0x78] sm:$0xff] }
  0x34   : > { %484 = vrot.lane.b32.xlu0 %v464_v16, %s1635_s20  ;;  %v461_v57 = vsel %vm455_vm1, %v459_v23, %v460_v32  ;;  %v330_v58 = vunpack.c.l.b16 %v262_v46  ;;  %v235_v59 = vmax.f32 %v1820_v42, 0.0  ;;  %v1840_v63 = vpack.c.b16 %v303_v49, %v302_v47  ;;  %v1451_v16 = vld [vmem:[%s2186_s1 + $0x80] sm:$0xff]  ;;  %v1879_v49 = vld [vmem:[%s1735_s10 + $0xa8] sm:$0xff]  ;;  %730 = vmatpush.bf16.msra.mxu1 %v1438_v41 }
  0x35   : > { %441 = vrot.lane.b32.xlu1 %v366_v29, %s1634_s11  ;;  %v385_v62 = vor.u32 %v384_v48, %v380_v38  ;;  %v263_v2 = vpack.c.bf16 %v233_v50, %v233_v50  ;;  %v264_v3 = vpack.c.bf16 %v234_v53, %v234_v53  ;;  %v236_v10 = vmax.f32 %v1825_v54, 0.0  ;;  %860 = vmatpush.bf16.msra.mxu2 %v1451_v16  ;;  %v1444_v50 = vld [vmem:[%s2186_s1 + $0x48] sm:$0xff] }
  0x36   : > { %v338_v5 = vpack.c.b16 %v330_v58, %v330_v58  ;;  %v265_v6 = vpack.c.bf16 %v235_v59, %v235_v59  ;;  %v237_v11 = vmax.f32 %v1828_v55, 0.0  ;;  %v467_v19 = vsel %vm455_vm1, %v465_v40, %v466_v45  ;;  %v1887_v59 = vld [vmem:[%s1735_s10 + $0xb0] sm:$0xff]  ;;  %643 = vmatpush.bf16.msra.mxu0 %v1444_v50 }
  0x37   : > { %v390_v17 = vsel %vm342_vm0, %v385_v62, %v389_v56  ;;  %v304_v20 = vunpack.c.l.b16 %v263_v2  ;;  %v305_v21 = vunpack.c.l.b16 %v264_v3  ;;  %v468_v23 = vrot.slane %v1840_v63, 1  ;;  %v1891_v62 = vld [vmem:[%s1735_s10 + $0xb8] sm:$0x3] }
  0x38   : > { %482 = vrot.lane.b32.xlu2 %v461_v57, %s1635_s20  ;;  %v331_v24 = vunpack.c.l.b16 %v265_v6  ;;  %v392_v26 = vshrl.u32 %v1840_v63, 16  ;;  %v394_v27 = vshll.u32 %v1840_v63, 16  ;;  %v399_v29 = vshll.u32 %v338_v5, 16  ;;  %v1437_v6 = vld [vmem:[%s2186_s1 + $0x10] sm:$0xff] }
  0x39   : > { %v1865_v28 = vpack.c.b16 %v305_v21, %v304_v20  ;;  %v238_v30 = vmax.f32 %v1846_v9, 0.0  ;;  %v266_v32 = vpack.c.bf16 %v236_v10, %v236_v10  ;;  %v469_v33 = vrot.slane %v338_v5, 1  ;;  %861 = vmatpush.bf16.msra.mxu2 %v1450_v44  ;;  %v1449_v10 = vld [vmem:[%s2186_s1 + $0x70] sm:$0xff]  ;;  %v1443_v20 = vld [vmem:[%s2186_s1 + $0x40] sm:$0xff]  ;;  %731 = vmatpush.bf16.msra.mxu1 %v1437_v6 }
  0x3a   : > { %v1868_v38 = vpack.c.b16 %v331_v24, %v331_v24  ;;  %v396_v39 = vrot.slane %v394_v27, 1  ;;  %v267_v40 = vpack.c.bf16 %v237_v11, %v237_v11  ;;  %v401_v47 = vrot.slane %v399_v29, 1  ;;  %644 = vmatpush.bf16.msra.mxu0 %v1443_v20 }
  0x3b   : > { %v404_v45 = vshrl.u32 %v1865_v28, 16  ;;  %v406_v46 = vshll.u32 %v1865_v28, 16  ;;  %v268_v48 = vpack.c.bf16 %v238_v30, %v238_v30  ;;  %v306_v57 = vunpack.c.l.b16 %v266_v32 }
  0x3c   : > { %445 = vrot.lane.b32.xlu0 %v390_v17, %s1634_s11  ;;  %v411_v53 = vshll.u32 %v1868_v38, 16  ;;  %v397_v56 = vor.u32 %v396_v39, %v392_v26  ;;  %v307_v58 = vunpack.c.l.b16 %v267_v40  ;;  %v239_v5 = vmax.f32 %v1879_v49, 0.0  ;;  %v1917_v26 = vld [vmem:[%s1735_s10 + $0xc8] sm:$0xff] }
  0x3d   : > { %486 = vrot.lane.b32.xlu1 %v467_v19, %s1635_s20  ;;  %v408_v60 = vrot.slane %v406_v46, 1  ;;  %v332_v61 = vunpack.c.l.b16 %v268_v48  ;;  %v470_v11 = vsel %vm455_vm1, %v468_v23, %v469_v33  ;;  %v240_v17 = vmax.f32 %v1887_v59, 0.0  ;;  %v1906_v19 = vld [vmem:[%s1735_s10 + $0xc0] sm:$0xff]  ;;  %v1922_v33 = vld [vmem:[%s1735_s10 + $0xd0] sm:$0x3]  ;;  %862 = vmatpush.bf16.msra.mxu2 %v1449_v10 }
  0x3e   : > { %v413_v2 = vrot.slane %v411_v53, 1  ;;  %v402_v3 = vsel %vm342_vm0, %v397_v56, %v401_v47  ;;  %v1894_v4 = vpack.c.b16 %v307_v58, %v306_v57  ;;  %v471_v23 = vrot.slane %v1865_v28, 1 }
  0x3f   : > { %v409_v13 = vor.u32 %v408_v60, %v404_v45  ;;  %v340_v16 = vpack.c.b16 %v332_v61, %v332_v61  ;;  %v241_v24 = vmax.f32 %v1891_v62, 0.0  ;;  %v472_v30 = vrot.slane %v1868_v38, 1  ;;  %v1436_v45 = vld [vmem:[%s2186_s1 + $0x8] sm:$0xff] }
  0x40   : > { %447 = vrot.lane.b32.xlu2 %v402_v3, %s1634_s11  ;;  %v416_v21 = vshrl.u32 %v1894_v4, 16  ;;  %v418_v22 = vshll.u32 %v1894_v4, 16  ;;  %v269_v32 = vpack.c.bf16 %v239_v5, %v239_v5  ;;  %v270_v40 = vpack.c.bf16 %v240_v17, %v240_v17  ;;  %732 = vmatpush.bf16.msra.mxu1 %v1436_v45  ;;  %v1435_v5 = vld [vmem:[%s2186_s1] sm:$0xff] }
  0x41   : > { %v414_v27 = vsel %vm342_vm0, %v409_v13, %v413_v2  ;;  %v423_v29 = vshll.u32 %v340_v16, 16  ;;  %v271_v41 = vpack.c.bf16 %v241_v24, %v241_v24  ;;  %v242_v44 = vmax.f32 %v1906_v19, 0.0 }
  0x42   : > { %v420_v39 = vrot.slane %v418_v22, 1  ;;  %v308_v47 = vunpack.c.l.b16 %v269_v32  ;;  %v243_v48 = vmax.f32 %v1917_v26, 0.0  ;;  %v309_v50 = vunpack.c.l.b16 %v270_v40 }
  0x43   : > { %v425_v46 = vrot.slane %v423_v29, 1  ;;  %v333_v53 = vunpack.c.l.b16 %v271_v41  ;;  %v244_v56 = vmax.f32 %v1922_v33, 0.0  ;;  %v473_v57 = vsel %vm455_vm1, %v471_v23, %v472_v30 }
  0x44   : > { %488 = vrot.lane.b32.xlu0 %v470_v11, %s1635_s20  ;;  %v421_v38 = vor.u32 %v420_v39, %v416_v21  ;;  %v272_v58 = vpack.c.bf16 %v242_v44, %v242_v44  ;;  %v273_v60 = vpack.c.bf16 %v243_v48, %v243_v48  ;;  %v474_v61 = vrot.slane %v1894_v4, 1  ;;  %733 = vmatpush.bf16.msra.mxu1 %v1435_v5 }
  0x45   : > { %449 = vrot.lane.b32.xlu1 %v414_v27, %s1634_s11  ;;  %v475_v2 = vrot.slane %v340_v16, 1  ;;  %v274_v3 = vpack.c.bf16 %v244_v56, %v244_v56  ;;  %v1937_v6 = vpack.c.b16 %v309_v50, %v308_v47  ;;  %v341_v10 = vpack.c.b16 %v333_v53, %v333_v53  ;;  %v215_v56 = vld [vmem:[%s1735_s10 + $0xd8] sm:$0xff] }
  0x46   : > { %v544_v11 = vunpack.c.l.b16 %v272_v58  ;;  %v545_v13 = vunpack.c.l.b16 %v273_v60  ;;  %v426_v17 = vsel %vm342_vm0, %v421_v38, %v425_v46  ;;  %v245_v58 = vmax.f32 %v215_v56, 0.0 }
  0x47   : > { %v548_v20 = vunpack.c.l.b16 %v274_v3  ;;  %v428_v16 = vshrl.u32 %v1937_v6, 16  ;;  %v430_v22 = vshll.u32 %v1937_v6, 16  ;;  %v435_v23 = vshll.u32 %v341_v10, 16 }
  0x48   : > { %490 = vrot.lane.b32.xlu2 %v473_v57, %s1635_s20  ;;  %v1941_v21 = vpack.c.b16 %v545_v13, %v544_v11  ;;  %v476_v24 = vsel %vm455_vm1, %v474_v61, %v475_v2  ;;  %v477_v41 = vrot.slane %v1937_v6, 1  ;;  %v478_v44 = vrot.slane %v341_v10, 1  ;;  %v216_v57 = vld [vmem:[%s1735_s10 + $0xe0] sm:$0xff]  ;;  %v217_v61 = vld [vmem:[%s1735_s10 + $0xe8] sm:$0x3] }
  0x49   : > { %v549_v27 = vpack.c.b16 %v548_v20, %v548_v20  ;;  %v432_v32 = vrot.slane %v430_v22, 1  ;;  %v437_v39 = vrot.slane %v435_v23, 1  ;;  %v246_v60 = vmax.f32 %v216_v57, 0.0 }
  0x4a   : > { %v551_v29 = vshrl.u32 %v1941_v21, 16  ;;  %v553_v30 = vshll.u32 %v1941_v21, 16  ;;  %v479_v50 = vsel %vm455_vm1, %v477_v41, %v478_v44  ;;  %v247_v2 = vmax.f32 %v217_v61, 0.0 }
  0x4b   : > { %v558_v40 = vshll.u32 %v549_v27, 16  ;;  %v433_v46 = vor.u32 %v432_v32, %v428_v16  ;;  %v275_v3 = vpack.c.bf16 %v245_v58, %v245_v58  ;;  %v276_v5 = vpack.c.bf16 %v246_v60, %v246_v60  ;;  %v1442_v32 = vld [vmem:[%s2186_s1 + $0x38] sm:$0xff] }
  0x4c   : > { %451 = vrot.lane.b32.xlu0 %v426_v17, %s1634_s11  ;;  %v555_v45 = vrot.slane %v553_v30, 1  ;;  %v277_v10 = vpack.c.bf16 %v247_v2, %v247_v2  ;;  %v1448_v30 = vld [vmem:[%s2186_s1 + $0x68] sm:$0xff]  ;;  %645 = vmatpush.bf16.msra.mxu0 %v1442_v32 }
  0x4d   : > { %492 = vrot.lane.b32.xlu1 %v476_v24, %s1635_s20  ;;  %v560_v47 = vrot.slane %v558_v40, 1  ;;  %v438_v38 = vsel %vm342_vm0, %v433_v46, %v437_v39  ;;  %v777_v11 = vunpack.c.l.b16 %v275_v3  ;;  %v778_v13 = vunpack.c.l.b16 %v276_v5  ;;  %863 = vmatpush.bf16.msra.mxu2 %v1448_v30 }
  0x4e   : > { %v556_v48 = vor.u32 %v555_v45, %v551_v29  ;;  %v781_v20 = vunpack.c.l.b16 %v277_v10  ;;  %v1447_v45 = vld [vmem:[%s2186_s1 + $0x60] sm:$0xff] }
  0x4f   : > { %v1960_v17 = vpack.c.b16 %v778_v13, %v777_v11 }
  0x50   : > { %453 = vrot.lane.b32.xlu2 %v438_v38, %s1634_s11  ;;  %v561_v53 = vsel %vm342_vm0, %v556_v48, %v560_v47  ;;  %v782_v16 = vpack.c.b16 %v781_v20, %v781_v20  ;;  %v1441_v47 = vld [vmem:[%s2186_s1 + $0x30] sm:$0xff]  ;;  %v564_v38 = vrot.slane %v1941_v21, 1 }
  0x51   : > { %v786_v22 = vshll.u32 %v1960_v17, 16  ;;  %v784_v23 = vshrl.u32 %v1960_v17, 16  ;;  %v797_v41 = vrot.slane %v1960_v17, 1  ;;  %864 = vmatpush.bf16.msra.mxu2 %v1447_v45  ;;  %646 = vmatpush.bf16.msra.mxu0 %v1441_v47  ;;  %v1459_v47 = vld [vmem:[%s2187_s2 + $0x30] sm:$0xff] }
  0x52   : > { %v791_v29 = vshll.u32 %v782_v16, 16  ;;  %v798_v44 = vrot.slane %v782_v16, 1 }
  0x53   : > { %v788_v24 = vrot.slane %v786_v22, 1 }
  0x54   : > { %494 = vrot.lane.b32.xlu0 %v479_v50, %s1635_s20  ;;  %v793_v40 = vrot.slane %v791_v29, 1  ;;  %v799_v48 = vsel %vm455_vm1, %v797_v41, %v798_v44  ;;  %v565_v50 = vrot.slane %v549_v27, 1 }
  0x55   : > { %562 = vrot.lane.b32.xlu1 %v561_v53, %s1634_s11  ;;  %v789_v39 = vor.u32 %v788_v24, %v784_v23 }
  0x56   : > { %v566_v53 = vsel %vm455_vm1, %v564_v38, %v565_v50 }
  0x57   : > { %v794_v46 = vsel %vm342_vm0, %v789_v39, %v793_v40 }
  0x58   : > { %567 = vrot.lane.b32.xlu2 %v566_v53, %s1635_s20 }
  0x5c   : > { %795 = vrot.lane.b32.xlu0 %v794_v46, %s1634_s11 }
  0x5d   : > { %800 = vrot.lane.b32.xlu1 %v799_v48, %s1635_s20 }
  0x8a   : > { %v481_v56 = vpop.permute.xlu2 %480 }
  0x92   : > { %v483_v3 = vpop.permute.xlu2 %482 }
  0x9e   : > { %v444_v57 = vpop.permute.xlu0 %443 }
  0x9f   : > { %v440_v58 = vpop.permute.xlu1 %439  ;;  %v502_v27 = vsel %vm496_vm2, %v1761_v31, %v444_v57  ;;  %v1456_v57 = vld [vmem:[%s2187_s2 + $0x18] sm:$0xff] }
  0xa0   : > { %v498_v60 = vsel %vm496_vm2, %v1766_v35, %v440_v58 }
  0xa1   : > { %v515_v61 = vsel %vm513_vm3, %v498_v60, %v481_v56  ;;  %v1457_v56 = vld [vmem:[%s2187_s2 + $0x20] sm:$0xff] }
  0xa2   : > { %1345 = vmatmul.msk.bf16.vlgmr.msra.gmra.mxu1 %vm622_vm4, %v515_v61 }
  0xa6   : > { %v485_v2 = vpop.permute.xlu0 %484 }
  0xa7   : > { %v442_v5 = vpop.permute.xlu1 %441  ;;  %v519_v10 = vsel %vm513_vm3, %v502_v27, %v485_v2  ;;  %v1454_v27 = vld [vmem:[%s2187_s2 + $0x8] sm:$0xff] }
  0xa8   : > { %v500_v11 = vsel %vm496_vm2, %v1777_v51, %v442_v5  ;;  %1389 = vmatmul.msk.bf16.vlgmr.msra.gmra.mxu2 %vm622_vm4, %v519_v10  ;;  %v448_v51 = vpop.permute.xlu2 %447 }
  0xa9   : > { %v517_v13 = vsel %vm513_vm3, %v500_v11, %v483_v3  ;;  %v506_v22 = vsel %vm496_vm2, %v1840_v63, %v448_v51  ;;  %v1453_v3 = vld [vmem:[%s2187_s2] sm:$0xff] }
  0xaa   : > { %1313 = vmatmul.msk.bf16.vlgmr.msra.gmra.mxu0 %vm622_vm4, %v517_v13 }
  0xae   : > { %v446_v35 = vpop.permute.xlu0 %445 }
  0xaf   : > { %v504_v31 = vsel %vm496_vm2, %v1803_v25, %v446_v35  ;;  %v487_v20 = vpop.permute.xlu1 %486 }
  0xb0   : > { %v521_v16 = vsel %vm513_vm3, %v504_v31, %v487_v20  ;;  %v491_v30 = vpop.permute.xlu2 %490 }
  0xb2   : > { %1346 = vmatmul.msk.bf16.gmra.mxu1 %vm622_vm4, %v517_v13 }
  0xb6   : > { %v489_v23 = vpop.permute.xlu0 %488 }
  0xb7   : > { %v523_v24 = vsel %vm513_vm3, %v506_v22, %v489_v23  ;;  %v450_v25 = vpop.permute.xlu1 %449 }
  0xb8   : > { %1390 = vmatmul.msk.bf16.gmra.mxu2 %vm622_vm4, %v521_v16  ;;  %v508_v29 = vsel %vm496_vm2, %v1865_v28, %v450_v25  ;;  %v454_v28 = vpop.permute.xlu2 %453 }
  0xb9   : > { %v525_v32 = vsel %vm513_vm3, %v508_v29, %v491_v30  ;;  %v512_v44 = vsel %vm496_vm2, %v1937_v6, %v454_v28  ;;  %v1458_v6 = vld [vmem:[%s2187_s2 + $0x28] sm:$0xff] }
  0xba   : > { %1314 = vmatmul.msk.bf16.gmra.mxu0 %vm622_vm4, %v519_v10 }
  0xbe   : > { %v452_v63 = vpop.permute.xlu0 %451 }
  0xbf   : > { %v510_v39 = vsel %vm496_vm2, %v1894_v4, %v452_v63  ;;  %v493_v40 = vpop.permute.xlu1 %492  ;;  %v1460_v4 = vld [vmem:[%s2187_s2 + $0x38] sm:$0xff] }
  0xc0   : > { %v527_v41 = vsel %vm513_vm3, %v510_v39, %v493_v40  ;;  %1010 = vmatpush.bf16.msra.mxu3 %v1460_v4  ;;  %v568_v50 = vpop.permute.xlu2 %567 }
  0xc2   : > { %1347 = vmatmul.msk.bf16.gmra.mxu1 %vm622_vm4, %v519_v10 }
  0xc4   : > { %1011 = vmatpush.bf16.msra.mxu3 %v1459_v47 }
  0xc6   : > { %v495_v45 = vpop.permute.xlu0 %494 }
  0xc7   : > { %v529_v46 = vsel %vm513_vm3, %v512_v44, %v495_v45  ;;  %v563_v48 = vpop.permute.xlu1 %562 }
  0xc8   : > { %1391 = vmatmul.msk.bf16.gmra.mxu2 %vm622_vm4, %v523_v24  ;;  %v570_v38 = vsel %vm496_vm2, %v1941_v21, %v563_v48  ;;  %1012 = vmatpush.bf16.msra.mxu3 %v1458_v6  ;;  %v1455_v21 = vld [vmem:[%s2187_s2 + $0x10] sm:$0xff] }
  0xc9   : > { %v572_v53 = vsel %vm513_vm3, %v570_v38, %v568_v50 }
  0xca   : > { %1315 = vmatmul.msk.bf16.gmra.mxu0 %vm622_vm4, %v521_v16 }
  0xcc   : > { %1013 = vmatpush.bf16.msra.mxu3 %v1457_v56 }
  0xce   : > { %v796_v58 = vpop.permute.xlu0 %795 }
  0xcf   : > { %v803_v60 = vsel %vm496_vm2, %v1960_v17, %v796_v58  ;;  %v801_v61 = vpop.permute.xlu1 %800 }
  0xd0   : > { %1014 = vmatpush.bf16.msra.mxu3 %v1456_v57  ;;  %v805_v2 = vsel %vm513_vm3, %v803_v60, %v801_v61 }
  0xd2   : > { %1348 = vmatmul.msk.bf16.gmra.mxu1 %vm622_vm4, %v521_v16 }
  0xd4   : > { %1015 = vmatpush.bf16.msra.mxu3 %v1455_v21 }
  0xd8   : > { %1392 = vmatmul.msk.bf16.gmra.mxu2 %vm622_vm4, %v525_v32  ;;  %1016 = vmatpush.bf16.msra.mxu3 %v1454_v27 }
  0xda   : > { %1316 = vmatmul.msk.bf16.gmra.mxu0 %vm622_vm4, %v523_v24 }
  0xdc   : > { %1017 = vmatpush.bf16.msra.mxu3 %v1453_v3 }
  0xe2   : > { %1349 = vmatmul.msk.bf16.gmra.mxu1 %vm622_vm4, %v523_v24 }
  0xe8   : > { %1393 = vmatmul.msk.bf16.gmra.mxu2 %vm622_vm4, %v527_v41 }
  0xea   : > { %1317 = vmatmul.msk.bf16.gmra.mxu0 %vm622_vm4, %v525_v32 }
  0xf2   : > { %1350 = vmatmul.msk.bf16.gmra.mxu1 %vm622_vm4, %v525_v32 }
  0xf8   : > { %1394 = vmatmul.msk.bf16.gmra.mxu2 %vm622_vm4, %v529_v46 }
  0xfa   : > { %1318 = vmatmul.msk.bf16.gmra.mxu0 %vm622_vm4, %v527_v41 }
 0x102   : > { %1351 = vmatmul.msk.bf16.gmra.mxu1 %vm622_vm4, %v527_v41 }
 0x108   : > { %1395 = vmatmul.msk.bf16.gmra.mxu2 %vm622_vm4, %v572_v53 }
 0x10a   : > { %1319 = vmatmul.msk.bf16.gmra.mxu0 %vm622_vm4, %v529_v46 }
 0x112   : > { %1352 = vmatmul.msk.bf16.gmra.mxu1 %vm622_vm4, %v529_v46 }
 0x118   : > { %1396 = vmatmul.msk.bf16.gmra.mxu2 %vm622_vm4, %v805_v2 }
 0x11a   : > { %1320 = vmatmul.msk.bf16.gmra.mxu0 %vm622_vm4, %v572_v53 }
 0x11f   : > { %v735_v5 = vpop.f32.mrf.mxu1 }
 0x127   : > { %v648_v10 = vpop.f32.mrf.mxu0  ;;  %v737_v17 = vpop.f32.mrf.mxu1 }
 0x128   : > { %v736_v31 = vadd.f32 %v735_v5, %v648_v10 }
 0x12b   : > { %v866_v11 = vpop.f32.mrf.mxu2 }
 0x12c   : > { %v906_v20 = vadd.f32 %v866_v11, %v736_v31 }
 0x12e   : > { %v922_v23 = vmax.f32 %v906_v20, 0.0 }
 0x12f   : > { %v650_v13 = vpop.f32.mrf.mxu0  ;;  %v740_v35 = vpop.f32.mrf.mxu1 }
 0x130   : > { %v738_v16 = vadd.f32 %v737_v17, %v650_v13 }
 0x133   : > { %v868_v51 = vpop.f32.mrf.mxu2 }
 0x134   : > { %v907_v22 = vadd.f32 %v868_v51, %v738_v16 }
 0x136   : > { %v923_v24 = vmax.f32 %v907_v22, 0.0 }
 0x137   : > { %v653_v25 = vpop.f32.mrf.mxu0  ;;  %v742_v29 = vpop.f32.mrf.mxu1 }
 0x138   : > { %v938_v30 = vpack.c.bf16 %v923_v24, %v922_v23  ;;  %v741_v40 = vadd.f32 %v740_v35, %v653_v25 }
 0x13a   : > { %1018 = vmatmul.bf16.vlgmr.msra.gmra.mxu3 %v938_v30 }
 0x13b   : > { %v871_v32 = vpop.f32.mrf.mxu2 }
 0x13c   : > { %v908_v41 = vadd.f32 %v871_v32, %v741_v40 }
 0x13e   : > { %v924_v46 = vmax.f32 %v908_v41, 0.0 }
 0x13f   : > { %v655_v63 = vpop.f32.mrf.mxu0  ;;  %v745_v39 = vpop.f32.mrf.mxu1 }
 0x140   : > { %v743_v28 = vadd.f32 %v742_v29, %v655_v63 }
 0x143   : > { %v873_v44 = vpop.f32.mrf.mxu2 }
 0x144   : > { %v909_v45 = vadd.f32 %v873_v44, %v743_v28 }
 0x146   : > { %v925_v4 = vmax.f32 %v909_v45, 0.0 }
 0x147   : > { %v658_v47 = vpop.f32.mrf.mxu0  ;;  %v747_v48 = vpop.f32.mrf.mxu1 }
 0x148   : > { %v939_v6 = vpack.c.bf16 %v925_v4, %v924_v46  ;;  %v746_v56 = vadd.f32 %v745_v39, %v658_v47 }
 0x14a   : > { %1023 = vmatmul.bf16.gmra.mxu3 %v939_v6 }
 0x14b   : > { %v876_v38 = vpop.f32.mrf.mxu2 }
 0x14c   : > { %v910_v57 = vadd.f32 %v876_v38, %v746_v56 }
 0x14e   : > { %v926_v61 = vmax.f32 %v910_v57, 0.0 }
 0x14f   : > { %v660_v50 = vpop.f32.mrf.mxu0  ;;  %v750_v53 = vpop.f32.mrf.mxu1 }
 0x150   : > { %v748_v21 = vadd.f32 %v747_v48, %v660_v50 }
 0x153   : > { %v878_v58 = vpop.f32.mrf.mxu2 }
 0x154   : > { %v911_v60 = vadd.f32 %v878_v58, %v748_v21 }
 0x156   : > { %v927_v27 = vmax.f32 %v911_v60, 0.0 }
 0x157   : > { %v663_v2 = vpop.f32.mrf.mxu0  ;;  %v752_v3 = vpop.f32.mrf.mxu1 }
 0x158   : > { %v940_v5 = vpack.c.bf16 %v927_v27, %v926_v61  ;;  %v751_v13 = vadd.f32 %v750_v53, %v663_v2 }
 0x15a   : > { %1028 = vmatmul.bf16.gmra.mxu3 %v940_v5 }
 0x15b   : > { %v881_v10 = vpop.f32.mrf.mxu2 }
 0x15c   : > { %v912_v35 = vadd.f32 %v881_v10, %v751_v13 }
 0x15e   : > { %v928_v51 = vmax.f32 %v912_v35, 0.0 }
 0x15f   : > { %v665_v17 = vpop.f32.mrf.mxu0  ;;  %v755_v11 = vpop.f32.mrf.mxu1 }
 0x160   : > { %v753_v31 = vadd.f32 %v752_v3, %v665_v17 }
 0x163   : > { %v883_v20 = vpop.f32.mrf.mxu2 }
 0x164   : > { %v913_v16 = vadd.f32 %v883_v20, %v753_v31 }
 0x166   : > { %v929_v22 = vmax.f32 %v913_v16, 0.0 }
 0x167   : > { %v668_v23 = vpop.f32.mrf.mxu0  ;;  %v757_v24 = vpop.f32.mrf.mxu1 }
 0x168   : > { %v941_v25 = vpack.c.bf16 %v929_v22, %v928_v51  ;;  %v756_v63 = vadd.f32 %v755_v11, %v668_v23 }
 0x16a   : > { %1033 = vmatmul.bf16.gmra.mxu3 %v941_v25 }
 0x16b   : > { %v886_v29 = vpop.f32.mrf.mxu2 }
 0x16c   : > { %v914_v39 = vadd.f32 %v886_v29, %v756_v63 }
 0x16e   : > { %v930_v44 = vmax.f32 %v914_v39, 0.0 }
 0x16f   : > { %v670_v30 = vpop.f32.mrf.mxu0  ;;  %v760_v32 = vpop.f32.mrf.mxu1 }
 0x170   : > { %v758_v40 = vadd.f32 %v757_v24, %v670_v30 }
 0x173   : > { %v888_v41 = vpop.f32.mrf.mxu2 }
 0x174   : > { %v915_v28 = vadd.f32 %v888_v41, %v758_v40 }
 0x176   : > { %v931_v45 = vmax.f32 %v915_v28, 0.0 }
 0x177   : > { %v673_v46 = vpop.f32.mrf.mxu0  ;;  %v762_v47 = vpop.f32.mrf.mxu1 }
 0x178   : > { %v942_v4 = vpack.c.bf16 %v931_v45, %v930_v44  ;;  %v761_v38 = vadd.f32 %v760_v32, %v673_v46  ;;  %v1084_v44 = vrot.slane %v1749_v8, 1  ;;  %v1085_v45 = vrot.slane %v1753_v12, 1 }
 0x17a   : > { %1038 = vmatmul.bf16.gmra.mxu3 %v942_v4  ;;  %v1086_v46 = vsel %vm455_vm1, %v1084_v44, %v1085_v45 }
 0x17b   : > { %v891_v48 = vpop.f32.mrf.mxu2 }
 0x17c   : > { %v916_v50 = vadd.f32 %v891_v48, %v761_v38  ;;  %v1087_v48 = vrot.slane %v1757_v18, 1  ;;  %v1089_v38 = vrot.slane %v1738_v0, 1  ;;  %v1094_v0 = vrot.slane %v1764_v34, 1 }
 0x17d   : > { %v1099_v34 = vrot.slane %v1789_v7, 1  ;;  %v1104_v7 = vrot.slane %v1811_v36, 1  ;;  %v1109_v36 = vrot.slane %v1825_v54, 1  ;;  %v1114_v54 = vrot.slane %v1879_v49, 1 }
 0x17e   : > { %v932_v58 = vmax.f32 %v916_v50, 0.0  ;;  %v1088_v8 = vsel %vm455_vm1, %v1085_v45, %v1087_v48  ;;  %v1090_v50 = vrot.slane %v1741_v1, 1  ;;  %v1095_v1 = vrot.slane %v1771_v43, 1 }
 0x17f   : > { %v675_v6 = vpop.f32.mrf.mxu0  ;;  %v765_v56 = vpop.f32.mrf.mxu1  ;;  %v1100_v43 = vrot.slane %v1794_v14, 1  ;;  %v1105_v14 = vrot.slane %v1814_v37, 1  ;;  %v1110_v37 = vrot.slane %v1828_v55, 1  ;;  %v1115_v55 = vrot.slane %v1887_v59, 1 }
 0x180   : > { %v763_v53 = vadd.f32 %v762_v47, %v675_v6  ;;  %v1091_v18 = vsel %vm455_vm1, %v1089_v38, %v1090_v50  ;;  %v1119_v49 = vrot.slane %v1906_v19, 1  ;;  %v1120_v59 = vrot.slane %v1917_v26, 1 }
 0x181   : > { %v1116_v44 = vsel %vm455_vm1, %v1114_v54, %v1115_v55 }
 0x183   : > { %v893_v57 = vpop.f32.mrf.mxu2 }
 0x184   : > { %v917_v21 = vadd.f32 %v893_v57, %v763_v53  ;;  %v1537_v57 = vld [vmem:[%s1735_s10 + $0x40] sm:$0x3]  ;;  %s1430_s10 = sshll.u32 %s1616_s15, 4 }
 0x185   : > { %s1184_s7 = sadd.s32 %s1431_s6, %s1430_s10  ;;  %s1558_s10 = scalar_lea.hbm %s2188_s3, 512 }
 0x186   : > { %v933_v60 = vmax.f32 %v917_v21, 0.0  ;;  %v1092_v21 = vrot.slane %v1537_v57, 1  ;;  %s1432_s8 = sshll.u32 %s1184_s7, 3 }
 0x187   : > { %v678_v61 = vpop.f32.mrf.mxu0  ;;  %v767_v3 = vpop.f32.mrf.mxu1  ;;  %s1186_s15 = scalar_lea.hbm %s2188_s3, %s1432_s8 }
 0x188   : > { %v943_v27 = vpack.c.bf16 %v933_v60, %v932_v58  ;;  %v766_v10 = vadd.f32 %v765_v56, %v678_v61  ;;  %v1093_v58 = vsel %vm455_vm1, %v1090_v50, %v1092_v21  ;;  %s1189_s24 = sshll.u32 %s1186_s15, 4  ;;  %s1190_s24 = int_to_ptr.hbm [resolvable:$true] %s1189_s24 }
 0x189   : > { %s1552_s11 = sshra.s32 %s1190_s24, 4  ;;  %s1553_s11 = int_to_ptr.hbm [resolvable:$true] %s1552_s11 }
 0x18a   : > { %1043 = vmatmul.bf16.gmra.mxu3 %v943_v27  ;;  %v1096_v27 = vsel %vm455_vm1, %v1094_v0, %v1095_v1  ;;  %s1554_s20 = scalar_lea.hbm %s1553_s11, 128  ;;  %p1559_p2 = scmp.lt.s32.totalorder %s1553_s11, %s2188_s3 }
 0x18b   : > { %v896_v2 = vpop.f32.mrf.mxu2  ;;  %p1555_p13 = scmp.ne.s32.totalorder %s1553_s11, %s1554_s20  ;;  %p1560_p4 = scmp.lt.s32.totalorder %s1558_s10, %s1554_s20 }
 0x18c   : > { %v918_v17 = vadd.f32 %v896_v2, %v766_v10 }
 0x18d   : > { %p1556_p0 = pnand %p1555_p13, %p1709_p3  ;;  %p1561_p5 = por %p1560_p4, %p1559_p2 }
 0x18e   : > { %v934_v31 = vmax.f32 %v918_v17, 0.0 }
 0x18f   : > { %v680_v5 = vpop.f32.mrf.mxu0  ;;  %v770_v16 = vpop.f32.mrf.mxu1  ;;  %p1557_p1 = pneg %p1556_p0 }
 0x190   : > { %v768_v11 = vadd.f32 %v767_v3, %v680_v5  ;;  %v1097_v5 = vrot.slane %v1780_v52, 1  ;;  %v1102_v52 = vrot.slane %v1797_v15, 1  ;;  %v1107_v15 = vrot.slane %v1820_v42, 1 }
 0x191   : > { %v1112_v42 = vrot.slane %v1846_v9, 1  ;;  %v1117_v9 = vrot.slane %v1891_v62, 1  ;;  %v1121_v62 = vsel %vm455_vm1, %v1119_v49, %v1120_v59  ;;  %p1562_p6 = pnand %p1561_p5, %p1557_p1 }
 0x192   : > { %v1098_v10 = vsel %vm455_vm1, %v1095_v1, %v1097_v5 }
 0x193   : > { %v898_v13 = vpop.f32.mrf.mxu2 }
 0x194   : > { %v919_v35 = vadd.f32 %v898_v13, %v768_v11  ;;  %v1101_v13 = vsel %vm455_vm1, %v1099_v34, %v1100_v43 }
 0x196   : > { %v935_v20 = vmax.f32 %v919_v35, 0.0 }
 0x197   : > { %v683_v51 = vpop.f32.mrf.mxu0  ;;  %v772_v29 = vpop.f32.mrf.mxu1 }
 0x198   : > { %v944_v22 = vpack.c.bf16 %v935_v20, %v934_v31  ;;  %v771_v25 = vadd.f32 %v770_v16, %v683_v51  ;;  %v1103_v20 = vsel %vm455_vm1, %v1100_v43, %v1102_v52 }
 0x19a   : > { %1048 = vmatmul.bf16.gmra.mxu3 %v944_v22  ;;  %v1106_v22 = vsel %vm455_vm1, %v1104_v7, %v1105_v14 }
 0x19b   : > { %v901_v23 = vpop.f32.mrf.mxu2 }
 0x19c   : > { %v920_v30 = vadd.f32 %v901_v23, %v771_v25  ;;  %v1108_v25 = vsel %vm455_vm1, %v1105_v14, %v1107_v15 }
 0x19e   : > { %v936_v40 = vmax.f32 %v920_v30, 0.0 }
 0x19f   : > { %v685_v24 = vpop.f32.mrf.mxu0 }
 0x1a0   : > { %v773_v32 = vadd.f32 %v772_v29, %v685_v24 }
 0x1a3   : > { %v903_v63 = vpop.f32.mrf.mxu2 }
 0x1a4   : > { %v921_v39 = vadd.f32 %v903_v63, %v773_v32  ;;  %v1111_v32 = vsel %vm455_vm1, %v1109_v36, %v1110_v37 }
 0x1a6   : > { %v937_v41 = vmax.f32 %v921_v39, 0.0 }
 0x1a8   : > { %v945_v28 = vpack.c.bf16 %v937_v41, %v936_v40  ;;  %v1113_v40 = vsel %vm455_vm1, %v1110_v37, %v1112_v42 }
 0x1aa   : > { %1053 = vmatmul.bf16.gmra.mxu3 %v945_v28 }
 0x1bd   : > { %v1019_v4 = vpop.f32.mrf.mxu3 }
 0x1be   : > { %v1140_v47 = vadd.f32 %v1086_v46, %v1019_v4  ;;  %v1118_v4 = vsel %vm455_vm1, %v1115_v55, %v1117_v9 }
 0x1c0   : > { %1156 = vst.msk [vmem:[%s2069_s5] sm:$0xff] %vm496_vm2, %v1140_v47 }
 0x1c5   : > { %v1021_v6 = vpop.f32.mrf.mxu3 }
 0x1c6   : > { %v1141_v12 = vadd.f32 %v1088_v8, %v1021_v6 }
 0x1c8   : > { %1157 = vst.msk [vmem:[%s2069_s5 + $0x8] sm:$0xff] %vm496_vm2, %v1141_v12  ;;  %v1122_v12 = vrot.slane %v1922_v33, 1 }
 0x1ca   : > { %v1123_v19 = vsel %vm455_vm1, %v1120_v59, %v1122_v12 }
 0x1cd   : > { %v1024_v53 = vpop.f32.mrf.mxu3 }
 0x1ce   : > { %v1142_v56 = vadd.f32 %v1091_v18, %v1024_v53 }
 0x1d0   : > { %1158 = vst.msk [vmem:[%s2069_s5 + $0x10] sm:$0xff] %vm496_vm2, %v1142_v56 }
 0x1d5   : > { %v1026_v60 = vpop.f32.mrf.mxu3 }
 0x1d6   : > { %v1143_v61 = vadd.f32 %v1093_v58, %v1026_v60 }
 0x1d8   : > { %1159 = vst.msk [vmem:[%s2069_s5 + $0x18] sm:$0xff] %vm496_vm2, %v1143_v61 }
 0x1dd   : > { %v1029_v2 = vpop.f32.mrf.mxu3 }
 0x1de   : > { %v1144_v3 = vadd.f32 %v1096_v27, %v1029_v2 }
 0x1e0   : > { %1160 = vst.msk [vmem:[%s2069_s5 + $0x20] sm:$0xff] %vm496_vm2, %v1144_v3 }
 0x1e5   : > { %v1031_v17 = vpop.f32.mrf.mxu3 }
 0x1e6   : > { %v1145_v11 = vadd.f32 %v1098_v10, %v1031_v17 }
 0x1e8   : > { %1161 = vst.msk [vmem:[%s2069_s5 + $0x28] sm:$0xff] %vm496_vm2, %v1145_v11 }
 0x1ed   : > { %v1034_v35 = vpop.f32.mrf.mxu3 }
 0x1ee   : > { %v1146_v31 = vadd.f32 %v1101_v13, %v1034_v35 }
 0x1f0   : > { %1162 = vst.msk [vmem:[%s2069_s5 + $0x30] sm:$0xff] %vm496_vm2, %v1146_v31 }
 0x1f5   : > { %v1036_v16 = vpop.f32.mrf.mxu3 }
 0x1f6   : > { %v1147_v51 = vadd.f32 %v1103_v20, %v1036_v16 }
 0x1f8   : > { %1163 = vst.msk [vmem:[%s2069_s5 + $0x38] sm:$0xff] %vm496_vm2, %v1147_v51 }
 0x1fd   : > { %v1039_v23 = vpop.f32.mrf.mxu3 }
 0x1fe   : > { %v1148_v24 = vadd.f32 %v1106_v22, %v1039_v23 }
 0x200   : > { %1164 = vst.msk [vmem:[%s2069_s5 + $0x40] sm:$0xff] %vm496_vm2, %v1148_v24 }
 0x205   : > { %v1041_v29 = vpop.f32.mrf.mxu3 }
 0x206   : > { %v1149_v30 = vadd.f32 %v1108_v25, %v1041_v29 }
 0x208   : > { %1165 = vst.msk [vmem:[%s2069_s5 + $0x48] sm:$0xff] %vm496_vm2, %v1149_v30 }
 0x20d   : > { %v1044_v63 = vpop.f32.mrf.mxu3 }
 0x20e   : > { %v1150_v39 = vadd.f32 %v1111_v32, %v1044_v63 }
 0x210   : > { %1166 = vst.msk [vmem:[%s2069_s5 + $0x50] sm:$0xff] %vm496_vm2, %v1150_v39 }
 0x215   : > { %v1046_v41 = vpop.f32.mrf.mxu3 }
 0x216   : > { %v1151_v28 = vadd.f32 %v1113_v40, %v1046_v41 }
 0x218   : > { %1167 = vst.msk [vmem:[%s2069_s5 + $0x58] sm:$0xff] %vm496_vm2, %v1151_v28 }
 0x21d   : > { %v1049_v45 = vpop.f32.mrf.mxu3 }
 0x21e   : > { %v1152_v46 = vadd.f32 %v1116_v44, %v1049_v45 }
 0x220   : > { %1168 = vst.msk [vmem:[%s2069_s5 + $0x60] sm:$0xff] %vm496_vm2, %v1152_v46 }
 0x225   : > { %v1051_v47 = vpop.f32.mrf.mxu3 }
 0x226   : > { %v1153_v48 = vadd.f32 %v1118_v4, %v1051_v47 }
 0x228   : > { %1169 = vst.msk [vmem:[%s2069_s5 + $0x68] sm:$0xff] %vm496_vm2, %v1153_v48 }
 0x22d   : > { %v1054_v8 = vpop.f32.mrf.mxu3 }
 0x22e   : > { %v1154_v6 = vadd.f32 %v1121_v62, %v1054_v8 }
 0x230   : > { %1170 = vst.msk [vmem:[%s2069_s5 + $0x70] sm:$0xff] %vm496_vm2, %v1154_v6 }
 0x235   : > { %v1056_v26 = vpop.f32.mrf.mxu3 }
 0x236   : > { %v1155_v38 = vadd.f32 %v1123_v19, %v1056_v26 }
 0x238   : > { %1171 = vst.msk [vmem:[%s2069_s5 + $0x78] sm:$0xff] %vm496_vm2, %v1155_v38 }
 0x239   : > { %1565 = shalt.err (!%p1562_p6)
}
 0x23a   : > { %s1636_s29 = smov 128   ;;  %s1637_s5 = smov 8  }
 0x23b   : > { %1462 = dma.vmem_to_hbm [thread:$0]  (%p1709_p3), %s1188_s16, 2048, %s1190_s24, %s1173_s27, %s1636_s29, %s1636_s29, %s1637_s5  }
 0x23c PF: > { %p1468_p7 = scmp.ge.s32.totalorder %s1632_s19, 2  ;;  %s1204_s8 = sand.u32 1, %s1604_s12  }
 0x23d   : > { %s1205_s9 = scalar_lea.sflag [#allocation3], %s1204_s8 }
 0x23e   : > { %p1465_p9 = pnand %p1468_p7, %p1718_p8 }
 0x240   : > { %p1466_p10 = pneg %p1465_p9 }
 0x242   : > { %1599 = dma.done.wait (%p1466_p10), %s1205_s9, 2048  }
 0x243   : > { %1601 = vsyncadd (%p1466_p10), %s1205_s9, 4294965248  ;;  %s16_s19 = sadd.s32 1, %s1632_s19   ;;  %s2191_s12 = smov %s1608_s13 }
 0x244   : > { %p13_p11 = scmp.ge.s32.totalorder %s16_s19, 6   ;;  %s2192_s13 = smov %s1612_s14 }
 0x245   : > { %s2193_s14 = smov %s1727_s30  ;;  %s2194_s15 = smov %s1624_s17 }
 0x246   : > { %s2195_s16 = smov %s1628_s18  ;;  %s2196_s17 = smov %s2199_s22 }
 0x247   : > { %s2197_s18 = smov %s2203_s23  ;;  %15 = sbr.rel (!%p13_p11) target bundleno = 5 (0x5), region = 70 }
 0x24c   :  { %1211 = vsyncpa [#allocation3], 1 }
 0x24d   :  { %1213 = vsyncpa [#allocation3 + $0x1], 1 }

</bundles_post_ra>
